<compile_context>
chip_gen: v5e
topology: v5e:2x2
jax: 0.10.0
libtpu: 0.0.40
codegen_flags: <defaults>
</compile_context>

<pallas_src>
import functools
import math

import jax
import jax.numpy as jnp
from jax.experimental import pallas as pl
from jax.experimental.pallas import tpu as pltpu


def _learnable_sigmoid_kernel(beta_ref, slope_ref, x_ref, o_ref, *, compute_dtype):
    # beta_ref:  SMEM (1,) f32 scalar
    # slope_ref: VMEM (1, lane) holding 0.5*slope, already in compute dtype (resident)
    # x_ref/o_ref: VMEM (tile_r, lane) in the I/O dtype
    half_beta = (0.5 * beta_ref[0]).astype(compute_dtype)
    x = x_ref[...].astype(compute_dtype)
    # beta * sigmoid(slope*x) = 0.5*beta * tanh(0.5*slope*x) + 0.5*beta
    # -> single EUP transcendental per element, one VPU mul, one mul+add.
    t = jnp.tanh(slope_ref[...] * x)          # slope_ref already holds slope/2
    o_ref[...] = (half_beta * t + half_beta).astype(o_ref.dtype)


def _pick_compute_dtype(x_dtype):
    """f32 unless the input is bf16 AND the chip has bf16 VPU/EUP (v6e / v7x)."""
    if x_dtype == jnp.bfloat16:
        try:
            kind = jax.devices()[0].device_kind.lower()
        except Exception:
            kind = ""
        if ("v6" in kind) or ("v7" in kind):
            return jnp.bfloat16
    return jnp.float32


def learnable_sigmoid(x, slope, beta=1.0):
    """x: (..., in_features); slope: (in_features,). Returns beta*sigmoid(slope*x)."""
    orig_shape = x.shape
    in_features = orig_shape[-1]
    assert slope.shape == (in_features,)
    dtype = x.dtype
    itemsize = jnp.dtype(dtype).itemsize
    total = math.prod(orig_shape)
    leading = total // in_features

    compute_dtype = _pick_compute_dtype(dtype)

    # ---- lane-dense packing (never pads, never copies in HBM) ---------------
    if in_features % 128 == 0:
        lane, repeat = in_features, 1
    else:
        folded = in_features * 128 // math.gcd(in_features, 128)  # lcm(F, 128)
        if folded <= 2048 and leading % (folded // in_features) == 0:
            lane, repeat = folded, folded // in_features           # exact reshape
        else:
            lane, repeat = in_features, 1                          # masked-store fallback

    rows = total // lane
    x2d = x.reshape(rows, lane)                                    # metadata-only

    # Resident slope row: cast + tile once, with the 1/2 from the tanh identity
    # pre-folded in (the row is tiny, so this wrapper-side work is negligible).
    slope_row = (0.5 * slope.astype(jnp.float32)).astype(compute_dtype)
    slope_row = jnp.tile(slope_row, repeat).reshape(1, lane)

    beta_arr = jnp.asarray([beta], dtype=jnp.float32)

    # ---- row tile: ~4 MiB blocks, rounded to the packed sublane multiple ----
    sub = 8 if itemsize >= 4 else (16 if itemsize == 2 else 32)
    target_block_bytes = 4 * 1024 * 1024
    tile_r = max(sub, (target_block_bytes // (lane * itemsize)) // sub * sub)
    if rows <= tile_r:
        if rows > sub:
            # Emit >= 2 grid steps so v7x's second TensorCore has work.
            half = -(-rows // 2)
            tile_r = -(-half // sub) * sub
            if tile_r >= rows:
                tile_r = rows
        else:
            tile_r = rows                                          # full-dim block (legal)

    grid = (pl.cdiv(rows, tile_r),)                                # ragged tail handled by Pallas

    cost = pl.CostEstimate(
        flops=4 * total,
        transcendentals=total,
        bytes_accessed=2 * total * itemsize + lane * jnp.dtype(compute_dtype).itemsize,
    )

    kernel = functools.partial(_learnable_sigmoid_kernel, compute_dtype=compute_dtype)

    out2d = pl.pallas_call(
        kernel,
        out_shape=jax.ShapeDtypeStruct((rows, lane), dtype),
        grid_spec=pltpu.PrefetchScalarGridSpec(
            num_scalar_prefetch=0,
            grid=grid,
            in_specs=[
                pl.BlockSpec(memory_space=pltpu.MemorySpace.SMEM),    # beta scalar
                pl.BlockSpec((1, lane), lambda i: (0, 0)),            # 0.5*slope (resident)
                pl.BlockSpec((tile_r, lane), lambda i: (i, 0)),       # x tile
            ],
            out_specs=pl.BlockSpec((tile_r, lane), lambda i: (i, 0)),
        ),
        compiler_params=pltpu.CompilerParams(
            dimension_semantics=("parallel",),          # v7x: shard rows across 2 TCs
            vmem_limit_bytes=32 * 1024 * 1024,          # covers 4x ~4 MiB double-buffered blocks
        ),
        cost_estimate=cost,
    )(beta_arr, slope_row, x2d)

    return out2d.reshape(orig_shape)


if __name__ == "__main__":
    key = jax.random.PRNGKey(0)

    # Shapes implied by the module: (batch, seq, in_features), slope: (in_features,)
    batch, seq, in_features = 2, 8, 32
    beta = 1.0
    slope = jnp.ones((in_features,), dtype=jnp.float32)   # matches nn.Parameter(torch.ones(F))
    x = jax.random.normal(key, (batch, seq, in_features), dtype=jnp.float32)

    out = jax.block_until_ready(learnable_sigmoid(x, slope, beta=beta))
    ref = beta * jax.nn.sigmoid(slope * x)
    assert out.shape == x.shape and out.dtype == x.dtype
    assert jnp.allclose(out, ref, atol=1e-5), "mismatch vs reference (small)"

    # Tiled path: F multiple of 128, multiple pipelined / megacore-parallel grid steps.
    x_big = jax.random.normal(jax.random.PRNGKey(1), (4, 2048, 256), dtype=jnp.float32)
    slope_big = jax.random.uniform(jax.random.PRNGKey(2), (256,), dtype=jnp.float32) + 0.5
    out_big = jax.block_until_ready(learnable_sigmoid(x_big, slope_big, beta=2.0))
    ref_big = 2.0 * jax.nn.sigmoid(slope_big * x_big)
    assert jnp.allclose(out_big, ref_big, atol=1e-5), "mismatch vs reference (big)"

    # Non-128-friendly F with a ragged row grid (fallback lane, no padding path).
    x_odd = jax.random.normal(jax.random.PRNGKey(3), (3, 37, 96), dtype=jnp.float32)
    slope_odd = jax.random.uniform(jax.random.PRNGKey(4), (96,), dtype=jnp.float32) + 0.5
    out_odd = jax.block_until_ready(learnable_sigmoid(x_odd, slope_odd, beta=0.7))
    ref_odd = 0.7 * jax.nn.sigmoid(slope_odd * x_odd)
    assert jnp.allclose(out_odd, ref_odd, atol=1e-5), "mismatch vs reference (odd)"

    # bf16 path (bf16 compute on v6e/v7x, f32 upcast on older chips).
    x_bf = jax.random.normal(jax.random.PRNGKey(5), (2, 1024, 128), dtype=jnp.bfloat16)
    slope_bf = jnp.linspace(0.5, 1.5, 128, dtype=jnp.float32)
    out_bf = jax.block_until_ready(learnable_sigmoid(x_bf, slope_bf, beta=1.3))
    ref_bf = 1.3 * jax.nn.sigmoid(slope_bf * x_bf.astype(jnp.float32))
    assert out_bf.dtype == jnp.bfloat16
    assert jnp.allclose(out_bf.astype(jnp.float32), ref_bf, atol=3e-2), \
        "mismatch vs reference (bf16)"

    print("KERNEL_OK")
</pallas_src>

<mosaic_0001>
module attributes {stable_mosaic.version = 11 : i64} {
  func.func @_learnable_sigmoid_kernel(%arg0: i32, %arg1: memref<1xf32, #tpu.memory_space<smem>>, %arg2: memref<1x128xf32, #tpu.memory_space<vmem>>, %arg3: memref<4x128xf32, #tpu.memory_space<vmem>>, %arg4: memref<4x128xf32, #tpu.memory_space<vmem>>) attributes {dimension_semantics = [#tpu.dimension_semantics<parallel>], iteration_bounds = array<i64: 1>, scalar_prefetch = 0 : i64, scratch_operands = 0 : i64, tpu.core_type = #tpu.core_type<tc>, window_params = [{transform_indices = @transform_0, window_bounds = array<i64: 1>}, {pipeline_mode = #tpu.pipeline_mode<synchronous>, transform_indices = @transform_1, window_bounds = array<i64: 1, 128>}, {transform_indices = @transform_2, window_bounds = array<i64: 4, 128>}, {transform_indices = @transform_3, window_bounds = array<i64: 4, 128>}]} {
    %c0 = arith.constant 0 : index
    %0 = memref.load %arg1[%c0] : memref<1xf32, #tpu.memory_space<smem>>
    %cst = arith.constant 5.000000e-01 : f32
    %1 = arith.mulf %cst, %0 : f32
    %c0_0 = arith.constant 0 : index
    %c0_1 = arith.constant 0 : index
    %2 = vector.load %arg3[%c0_0, %c0_1] : memref<4x128xf32, #tpu.memory_space<vmem>>, vector<4x128xf32>
    %c0_2 = arith.constant 0 : index
    %c0_3 = arith.constant 0 : index
    %3 = vector.load %arg2[%c0_2, %c0_3] : memref<1x128xf32, #tpu.memory_space<vmem>>, vector<1x128xf32>
    %4 = vector.broadcast %3 : vector<1x128xf32> to vector<4x128xf32>
    %5 = arith.mulf %4, %2 : vector<4x128xf32>
    %6 = math.tanh %5 : vector<4x128xf32>
    %7 = vector.broadcast %1 : f32 to vector<4x128xf32>
    %8 = arith.mulf %7, %6 : vector<4x128xf32>
    %9 = vector.broadcast %1 : f32 to vector<4x128xf32>
    %10 = arith.addf %8, %9 : vector<4x128xf32>
    %c0_4 = arith.constant 0 : index
    %c0_5 = arith.constant 0 : index
    %11 = vector.load %arg4[%c0_4, %c0_5] : memref<4x128xf32, #tpu.memory_space<vmem>>, vector<4x128xf32>
    tpu.vector_store %arg4[%c0_4, %c0_5], %10 {strides = array<i32>} : memref<4x128xf32, #tpu.memory_space<vmem>>, vector<4x128xf32>,
    return
  }
  func.func @transform_0(%arg0: i32) -> i32 {
    %c0_i32 = arith.constant 0 : i32
    %c0_i32_0 = arith.constant 0 : i32
    return %c0_i32 : i32
  }
  func.func @transform_1(%arg0: i32) -> (i32, i32) {
    %c0_i32 = arith.constant 0 : i32
    %c0_i32_0 = arith.constant 0 : i32
    %c0_i32_1 = arith.constant 0 : i32
    return %c0_i32, %c0_i32_0 : i32, i32
  }
  func.func @transform_2(%arg0: i32) -> (i32, i32) {
    %c0_i32 = arith.constant 0 : i32
    %c0_i32_0 = arith.constant 0 : i32
    return %arg0, %c0_i32 : i32, i32
  }
  func.func @transform_3(%arg0: i32) -> (i32, i32) {
    %c0_i32 = arith.constant 0 : i32
    %c0_i32_0 = arith.constant 0 : i32
    return %arg0, %c0_i32 : i32, i32
  }
}

</mosaic_0001>

<bundles_post_ra>
// kernel: tpu_custom_call.1
= control target key start
LH: loop header
LB: loop body
LE: loop exit
PB: predicated region body
PF: predicated region fallthrough
CT: control target
= control target key end

     0   :  { %9 = vsyncpa [#allocation4], 0  ;;  %s151_s0 = inlined_call_operand.<no memory space> [shape: f32[1], index: 0, kind: input, shape index: {}]   ;;  %s152_s1 = inlined_call_operand.vmem [shape: f32[1,128], index: 1, kind: input, shape index: {}]   ;;  %s153_s2 = inlined_call_operand.hbm [shape: f32[4,128], index: 2, kind: input, shape index: {}]   ;;  %s154_s3 = inlined_call_operand.hbm [shape: f32[4,128], index: 3, kind: output, shape index: {}]  }
   0x1   :  { %10 = vsyncpa [#allocation5], 0  ;;  %s20_s14 = sshll.u32 %s153_s2, 4  ;;  %s117_s15 = smov [#allocation3]   ;;  %s21_s14 = int_to_ptr.hbm [resolvable:$true] %s20_s14 }
   0x2   :  { %s22_s16 = sshll.u32 %s117_s15, 4  ;;  %s23_s16 = int_to_ptr.vmem [resolvable:$true] %s22_s16 }
   0x3   :  { %25 = dma.hbm_to_vmem [thread:$0]  %s21_s14, 64, %s23_s16, [#allocation4]  }
   0x4   :  { %113 = dma.done.wait [#allocation4], 64  }
   0x5   :  { %114 = vsyncadd [#allocation4], 4294967232  ;;  %v32_v0 = vld [vmem:[#allocation3] sm:$0xf]  ;;  %s31_s21 = smul.f32 0.5, %s151_s0  ;;  %s118_s2 = smov [#allocation6]  }
   0x6   :  { %v62_v1 = vld [vmem:[%s152_s1] ss:$0 sm:$0xff]  ;;  %s48_s22 = sshll.u32 %s118_s2, 4  ;;  %s50_s25 = sshll.u32 %s154_s3, 4  ;;  %s49_s22 = int_to_ptr.vmem [resolvable:$true] %s48_s22  ;;  %s51_s25 = int_to_ptr.hbm [resolvable:$true] %s50_s25 }
   0x7   :  { %v37_v2 = vmul.f32 %v62_v1, %v32_v0  ;;  %v39_v3 = vstv %s31_s21 }
   0x9   :  { %63 = vtanh.f32 %v37_v2 }
   0xf   :  { %v64_v4 = vpop.eup %63 }
  0x10   :  { %v40_v5 = vmul.f32 %v64_v4, %v39_v3 }
  0x12   :  { %v41_v6 = vadd.f32 %v40_v5, %v39_v3 }
  0x14   :  { %42 = vst [vmem:[#allocation6] sm:$0xf] %v41_v6 }
  0x15   :  { %53 = dma.vmem_to_hbm [thread:$0]  %s49_s22, 64, %s51_s25, [#allocation5]  }
  0x16   :  { %115 = dma.done.wait [#allocation5], 64  }
  0x17   :  { %116 = vsyncadd [#allocation5], 4294967232 }
  0x18   :  { %58 = vsyncpa [#allocation4], 1 }
  0x19   :  { %59 = vsyncpa [#allocation5], 1 }

</bundles_post_ra>
